<compile_context>
chip_gen: v7x
topology: tpu7x:2x2x1
jax: 0.10.0
libtpu: 0.0.40
codegen_flags: <defaults>
</compile_context>

<pallas_src>
import functools

import jax
import jax.numpy as jnp
from jax import lax
from jax.experimental import pallas as pl
from jax.experimental.pallas import tpu as pltpu


def _round_up(x, m):
    return ((x + m - 1) // m) * m


def _vmem_budget(block_bytes, scratch_bytes):
    # double-buffered pipeline blocks + scratch + compiler margin, clamped to sane bounds
    need = 2 * sum(block_bytes) + sum(scratch_bytes) + (2 << 20)
    return int(min(max(need, 32 << 20), 100 << 20))


# ------------------- stage 1: K/V in-projection (runs once per batch) ------------------- #

def _kv_project_kernel(k_ref, v_ref, wk_ref, bk_ref, wv_ref, bv_ref,
                       kh_ref, vh_ref, proj_scr, *, nhead, head_dim):
    """One grid step = one batch element.

    k_ref/v_ref: (S, E); weights (E, E) already transposed to (in, out); biases (1, E).
    kh_ref/vh_ref: (nhead, S, D) head-major outputs.  proj_scr: (S, E) f32 VMEM scratch.
    """
    cdt = wk_ref.dtype
    # K projection: one (S,E) x (E,E) MXU call, f32 accumulation, then scatter per head.
    proj_scr[...] = jnp.dot(k_ref[...].astype(cdt), wk_ref[...],
                            preferred_element_type=jnp.float32) + bk_ref[...]
    for h in range(nhead):
        kh_ref[h] = proj_scr[:, h * head_dim:(h + 1) * head_dim].astype(kh_ref.dtype)
    # V projection (re-uses the same scratch).
    proj_scr[...] = jnp.dot(v_ref[...].astype(cdt), wv_ref[...],
                            preferred_element_type=jnp.float32) + bv_ref[...]
    for h in range(nhead):
        vh_ref[h] = proj_scr[:, h * head_dim:(h + 1) * head_dim].astype(vh_ref.dtype)


# ------------- stage 2: Q projection + attention + out-projection (fused) -------------- #

def _attention_kernel(q_ref, kh_ref, vh_ref, wq_ref, bq_ref, wo_ref, bo_ref,
                      o_ref, w_ref, q_scr, acc_scr, *, nhead, head_dim):
    """One grid step = one (batch, L-tile) pair.

    q_ref: (tl, E); kh_ref/vh_ref: (nhead, S, D) head-major (constant within a batch);
    o_ref: (tl, E); w_ref: (nhead, tl, S); q_scr/acc_scr: (tl, E) VMEM scratch.
    """
    cdt = wq_ref.dtype
    # Q in-projection for this tile: ONE big MXU call (softmax scale pre-folded into Wq/bq).
    q_scr[...] = (jnp.dot(q_ref[...].astype(cdt), wq_ref[...],
                          preferred_element_type=jnp.float32)
                  + bq_ref[...]).astype(q_scr.dtype)

    for h in range(nhead):                       # small static head loop
        sl = slice(h * head_dim, (h + 1) * head_dim)
        qh = q_scr[:, sl]                        # (tl, D) cheap VMEM slice load
        kh = kh_ref[h]                           # (S,  D) leading-axis head index (free)
        vh = vh_ref[h]                           # (S,  D)

        # scores = qh @ kh.T without materialising a transpose.
        s = lax.dot_general(qh, kh, (((1,), (1,)), ((), ())),
                            preferred_element_type=jnp.float32)          # (tl, S)

        # Numerically stable softmax; reciprocal on the EUP + one Newton step.
        m = jnp.max(s, axis=-1, keepdims=True)
        e = jnp.exp(s - m)
        d = jnp.sum(e, axis=-1, keepdims=True)
        inv = pl.reciprocal(d, approx=True)
        inv = inv * (2.0 - d * inv)
        p = e * inv                                                       # (tl, S)

        w_ref[h] = p.astype(w_ref.dtype)
        # Head output goes straight to the VMEM accumulator slice (no concat, no big
        # vreg live ranges).
        acc_scr[:, sl] = jnp.dot(p.astype(cdt), vh,
                                 preferred_element_type=jnp.float32)      # (tl, D)

    # Out-projection from the accumulator: one big MXU call.
    o_ref[...] = (jnp.dot(acc_scr[...].astype(cdt), wo_ref[...],
                          preferred_element_type=jnp.float32)
                  + bo_ref[...]).astype(o_ref.dtype)


# ------------------------------------ module forward ------------------------------------ #

def mha_container_forward(query, key, value, params, nhead, *,
                          compute_dtype=jnp.float32):
    """MultiheadAttentionContainer.forward.

    query: (L, N, E), key/value: (S, N, E)
    returns attn_output (L, N, E), attn_output_weights (N*nhead, L, S)

    compute_dtype: dtype fed to the MXU (f32 accumulation always).  jnp.bfloat16 is
    recommended on v6e/v7x for ~2x matmul throughput and half the K/V VMEM footprint.
    """
    L, N, E = query.shape
    S = key.shape[0]
    assert E % nhead == 0, "embed_dim must be divisible by nhead"
    D = E // nhead
    scale = float(D) ** -0.5
    cdt = jnp.dtype(compute_dtype)
    out_dtype = query.dtype
    isz = lambda dt: jnp.dtype(dt).itemsize

    # One-time weight prep: torch (out,in) -> (in,out); fold softmax scale into Wq/bq.
    wqT = (params["wq"].T * scale).astype(cdt)
    wkT = params["wk"].T.astype(cdt)
    wvT = params["wv"].T.astype(cdt)
    woT = params["wo"].T.astype(cdt)
    bq = (params["bq"] * scale).reshape(1, E).astype(jnp.float32)
    bk = params["bk"].reshape(1, E).astype(jnp.float32)
    bv = params["bv"].reshape(1, E).astype(jnp.float32)
    bo = params["bo"].reshape(1, E).astype(jnp.float32)

    # Batch-leading layout (one-time XLA transposes).  Keeps every Pallas block layout-legal
    # (last two block dims equal the full array dims or 8/128-aligned) and lets the batch
    # axis be a "parallel" grid dimension.
    q_t = jnp.transpose(query, (1, 0, 2))   # (N, L, E)
    k_t = jnp.transpose(key, (1, 0, 2))     # (N, S, E)
    v_t = jnp.transpose(value, (1, 0, 2))   # (N, S, E)

    # ---------------- stage 1: project K/V once, emit head-major (N, H, S, D) -------------
    kv_blocks = [S * E * isz(key.dtype), S * E * isz(value.dtype),
                 E * E * isz(cdt), E * 4, E * E * isz(cdt), E * 4,
                 nhead * S * D * isz(cdt), nhead * S * D * isz(cdt)]
    k_heads, v_heads = pl.pallas_call(
        functools.partial(_kv_project_kernel, nhead=nhead, head_dim=D),
        out_shape=(jax.ShapeDtypeStruct((N, nhead, S, D), cdt),
                   jax.ShapeDtypeStruct((N, nhead, S, D), cdt)),
        grid=(N,),
        in_specs=[
            pl.BlockSpec((None, S, E), lambda n: (n, 0, 0)),      # key   (this batch)
            pl.BlockSpec((None, S, E), lambda n: (n, 0, 0)),      # value (this batch)
            pl.BlockSpec((E, E), lambda n: (0, 0)),               # Wk^T
            pl.BlockSpec((1, E), lambda n: (0, 0)),               # bk
            pl.BlockSpec((E, E), lambda n: (0, 0)),               # Wv^T
            pl.BlockSpec((1, E), lambda n: (0, 0)),               # bv
        ],
        out_specs=(pl.BlockSpec((None, nhead, S, D), lambda n: (n, 0, 0, 0)),
                   pl.BlockSpec((None, nhead, S, D), lambda n: (n, 0, 0, 0))),
        scratch_shapes=[pltpu.VMEM((S, E), jnp.float32)],
        compiler_params=pltpu.CompilerParams(
            dimension_semantics=("parallel",),
            vmem_limit_bytes=_vmem_budget(kv_blocks, [S * E * 4])),
    )(k_t, v_t, wkT, bk, wvT, bv)

    # ------------- stage 2: fused Q-projection + attention + out-projection ---------------
    # Target-sequence tiling; pad L so the tile rules always hold (ragged L supported).
    tl = 128 if L >= 128 else _round_up(L, 8)
    Lp = _round_up(L, tl)
    if Lp != L:
        q_t = jnp.pad(q_t, ((0, 0), (0, Lp - L), (0, 0)))

    attn_blocks = [
        tl * E * isz(query.dtype),                 # q tile
        nhead * S * D * isz(cdt),                  # K heads (constant per batch)
        nhead * S * D * isz(cdt),                  # V heads (constant per batch)
        E * E * isz(cdt), E * 4,                   # Wq^T (scaled), bq (scaled)
        E * E * isz(cdt), E * 4,                   # Wo^T, bo
        tl * E * isz(out_dtype),                   # output tile
        nhead * tl * S * 4,                        # attention-weights tile
    ]
    attn_scratch = [tl * E * isz(cdt), tl * E * 4]

    o_t, w = pl.pallas_call(
        functools.partial(_attention_kernel, nhead=nhead, head_dim=D),
        out_shape=(jax.ShapeDtypeStruct((N, Lp, E), out_dtype),
                   jax.ShapeDtypeStruct((N * nhead, Lp, S), jnp.float32)),
        grid=(N, Lp // tl),
        in_specs=[
            pl.BlockSpec((None, tl, E), lambda n, i: (n, i, 0)),           # q tile
            pl.BlockSpec((None, nhead, S, D), lambda n, i: (n, 0, 0, 0)),  # K heads
            pl.BlockSpec((None, nhead, S, D), lambda n, i: (n, 0, 0, 0)),  # V heads
            pl.BlockSpec((E, E), lambda n, i: (0, 0)),                     # Wq^T (scaled)
            pl.BlockSpec((1, E), lambda n, i: (0, 0)),                     # bq (scaled)
            pl.BlockSpec((E, E), lambda n, i: (0, 0)),                     # Wo^T
            pl.BlockSpec((1, E), lambda n, i: (0, 0)),                     # bo
        ],
        out_specs=(
            pl.BlockSpec((None, tl, E), lambda n, i: (n, i, 0)),           # attn output
            pl.BlockSpec((nhead, tl, S), lambda n, i: (n, i, 0)),          # attn weights
        ),
        scratch_shapes=[pltpu.VMEM((tl, E), cdt),          # projected Q tile
                        pltpu.VMEM((tl, E), jnp.float32)],  # head-output accumulator
        compiler_params=pltpu.CompilerParams(
            dimension_semantics=("parallel", "parallel"),
            vmem_limit_bytes=_vmem_budget(attn_blocks, attn_scratch)),
    )(q_t, k_heads, v_heads, wqT, bq, woT, bo)

    attn_output = jnp.transpose(o_t[:, :L, :], (1, 0, 2))   # (L, N, E)
    attn_weights = w[:, :L, :]                               # (N*nhead, L, S)
    return attn_output, attn_weights


# --------------------------- pure-JAX reference (for checks) --------------------------- #

def _reference(query, key, value, params, nhead):
    L, N, E = query.shape
    S = key.shape[0]
    D = E // nhead
    q = query @ params["wq"].T + params["bq"]
    k = key @ params["wk"].T + params["bk"]
    v = value @ params["wv"].T + params["bv"]
    q = q.reshape(L, N * nhead, D).transpose(1, 0, 2) * (float(D) ** -0.5)
    k = k.reshape(S, N * nhead, D).transpose(1, 0, 2)
    v = v.reshape(S, N * nhead, D).transpose(1, 0, 2)
    s = jnp.einsum("bld,bsd->bls", q, k)
    p = jax.nn.softmax(s, axis=-1)
    o = jnp.einsum("bls,bsd->bld", p, v)
    o = o.transpose(1, 0, 2).reshape(L, N, E)
    o = o @ params["wo"].T + params["bo"]
    return o, p


if __name__ == "__main__":
    # Small shapes consistent with the module: L=S=8, batch N=2, embed E=32, 4 heads.
    L, S, N, E, nhead = 8, 8, 2, 32, 4

    key0 = jax.random.PRNGKey(0)
    ks = jax.random.split(key0, 11)
    bound = 1.0 / jnp.sqrt(E)  # torch.nn.Linear default init range
    params = {
        "wq": jax.random.uniform(ks[0], (E, E), jnp.float32, -bound, bound),
        "bq": jax.random.uniform(ks[1], (E,), jnp.float32, -bound, bound),
        "wk": jax.random.uniform(ks[2], (E, E), jnp.float32, -bound, bound),
        "bk": jax.random.uniform(ks[3], (E,), jnp.float32, -bound, bound),
        "wv": jax.random.uniform(ks[4], (E, E), jnp.float32, -bound, bound),
        "bv": jax.random.uniform(ks[5], (E,), jnp.float32, -bound, bound),
        "wo": jax.random.uniform(ks[6], (E, E), jnp.float32, -bound, bound),
        "bo": jax.random.uniform(ks[7], (E,), jnp.float32, -bound, bound),
    }

    query = jax.random.normal(ks[8], (L, N, E), jnp.float32)
    key_in = jax.random.normal(ks[9], (S, N, E), jnp.float32)
    value = jax.random.normal(ks[10], (S, N, E), jnp.float32)

    out, weights = jax.jit(
        functools.partial(mha_container_forward, nhead=nhead)
    )(query, key_in, value, params)
    jax.block_until_ready((out, weights))

    ref_out, ref_w = _reference(query, key_in, value, params, nhead)
    assert out.shape == (L, N, E)
    assert weights.shape == (N * nhead, L, S)
    # Slightly relaxed tolerance: EUP approx reciprocal (+ Newton refinement) and the
    # scale-folded Wq differ marginally from the einsum reference.
    assert jnp.allclose(out, ref_out, atol=1e-4, rtol=1e-4)
    assert jnp.allclose(weights, ref_w, atol=1e-4, rtol=1e-4)

    print("KERNEL_OK")
</pallas_src>

<mosaic_0001>
module attributes {stable_mosaic.version = 11 : i64} {
  func.func @_kv_project_kernel(%arg0: i32, %arg1: memref<1x8x32xf32, #tpu.memory_space<vmem>>, %arg2: memref<1x8x32xf32, #tpu.memory_space<vmem>>, %arg3: memref<32x32xf32, #tpu.memory_space<vmem>>, %arg4: memref<1x32xf32, #tpu.memory_space<vmem>>, %arg5: memref<32x32xf32, #tpu.memory_space<vmem>>, %arg6: memref<1x32xf32, #tpu.memory_space<vmem>>, %arg7: memref<1x4x8x8xf32, #tpu.memory_space<vmem>>, %arg8: memref<1x4x8x8xf32, #tpu.memory_space<vmem>>, %arg9: memref<8x32xf32, #tpu.memory_space<vmem>>) attributes {dimension_semantics = [#tpu.dimension_semantics<parallel>], iteration_bounds = array<i64: 2>, scalar_prefetch = 0 : i64, scratch_operands = 1 : i64, tpu.core_type = #tpu.core_type<tc>, window_params = [{transform_indices = @transform_0, window_bounds = array<i64: 1, 8, 32>}, {transform_indices = @transform_1, window_bounds = array<i64: 1, 8, 32>}, {pipeline_mode = #tpu.pipeline_mode<synchronous>, transform_indices = @transform_2, window_bounds = array<i64: 32, 32>}, {pipeline_mode = #tpu.pipeline_mode<synchronous>, transform_indices = @transform_3, window_bounds = array<i64: 1, 32>}, {pipeline_mode = #tpu.pipeline_mode<synchronous>, transform_indices = @transform_4, window_bounds = array<i64: 32, 32>}, {pipeline_mode = #tpu.pipeline_mode<synchronous>, transform_indices = @transform_5, window_bounds = array<i64: 1, 32>}, {transform_indices = @transform_6, window_bounds = array<i64: 1, 4, 8, 8>}, {transform_indices = @transform_7, window_bounds = array<i64: 1, 4, 8, 8>}]} {
    %c0 = arith.constant 0 : index
    %c0_0 = arith.constant 0 : index
    %c0_1 = arith.constant 0 : index
    %0 = vector.load %arg1[%c0, %c0_0, %c0_1] : memref<1x8x32xf32, #tpu.memory_space<vmem>>, vector<1x8x32xf32>
    %1 = vector.shape_cast %0 : vector<1x8x32xf32> to vector<8x32xf32>
    %c0_2 = arith.constant 0 : index
    %c0_3 = arith.constant 0 : index
    %2 = vector.load %arg3[%c0_2, %c0_3] : memref<32x32xf32, #tpu.memory_space<vmem>>, vector<32x32xf32>
    %cst = arith.constant dense<0.000000e+00> : vector<8x32xf32>
    %3 = tpu.matmul %1, %2, %cst {dimension_numbers = #tpu.dot_dimension_numbers<[1], [0], [0], [1], [0, 0, 1, 1], [], []>} : vector<8x32xf32>, vector<32x32xf32>, vector<8x32xf32> -> vector<8x32xf32>
    %c0_4 = arith.constant 0 : index
    %c0_5 = arith.constant 0 : index
    %4 = vector.load %arg4[%c0_4, %c0_5] : memref<1x32xf32, #tpu.memory_space<vmem>>, vector<1x32xf32>
    %5 = vector.broadcast %4 : vector<1x32xf32> to vector<8x32xf32>
    %6 = arith.addf %3, %5 : vector<8x32xf32>
    %c0_6 = arith.constant 0 : index
    %c0_7 = arith.constant 0 : index
    %7 = vector.load %arg9[%c0_6, %c0_7] : memref<8x32xf32, #tpu.memory_space<vmem>>, vector<8x32xf32>
    tpu.vector_store %arg9[%c0_6, %c0_7], %6 {strides = array<i32>} : memref<8x32xf32, #tpu.memory_space<vmem>>, vector<8x32xf32>,
    %c0_8 = arith.constant 0 : index
    %c0_9 = arith.constant 0 : index
    %8 = vector.load %arg9[%c0_8, %c0_9] : memref<8x32xf32, #tpu.memory_space<vmem>>, vector<8x8xf32>
    %c0_10 = arith.constant 0 : index
    %c0_11 = arith.constant 0 : index
    %c0_12 = arith.constant 0 : index
    %c0_13 = arith.constant 0 : index
    %9 = vector.load %arg7[%c0_10, %c0_11, %c0_12, %c0_13] : memref<1x4x8x8xf32, #tpu.memory_space<vmem>>, vector<1x1x8x8xf32>
    %10 = vector.shape_cast %9 : vector<1x1x8x8xf32> to vector<8x8xf32>
    %11 = vector.shape_cast %8 : vector<8x8xf32> to vector<1x1x8x8xf32>
    tpu.vector_store %arg7[%c0_10, %c0_11, %c0_12, %c0_13], %11 {strides = array<i32>} : memref<1x4x8x8xf32, #tpu.memory_space<vmem>>, vector<1x1x8x8xf32>,
    %c0_14 = arith.constant 0 : index
    %c8 = arith.constant 8 : index
    %12 = vector.load %arg9[%c0_14, %c8] : memref<8x32xf32, #tpu.memory_space<vmem>>, vector<8x8xf32>
    %c0_15 = arith.constant 0 : index
    %c1 = arith.constant 1 : index
    %c0_16 = arith.constant 0 : index
    %c0_17 = arith.constant 0 : index
    %13 = vector.load %arg7[%c0_15, %c1, %c0_16, %c0_17] : memref<1x4x8x8xf32, #tpu.memory_space<vmem>>, vector<1x1x8x8xf32>
    %14 = vector.shape_cast %13 : vector<1x1x8x8xf32> to vector<8x8xf32>
    %15 = vector.shape_cast %12 : vector<8x8xf32> to vector<1x1x8x8xf32>
    tpu.vector_store %arg7[%c0_15, %c1, %c0_16, %c0_17], %15 {strides = array<i32>} : memref<1x4x8x8xf32, #tpu.memory_space<vmem>>, vector<1x1x8x8xf32>,
    %c0_18 = arith.constant 0 : index
    %c16 = arith.constant 16 : index
    %16 = vector.load %arg9[%c0_18, %c16] : memref<8x32xf32, #tpu.memory_space<vmem>>, vector<8x8xf32>
    %c0_19 = arith.constant 0 : index
    %c2 = arith.constant 2 : index
    %c0_20 = arith.constant 0 : index
    %c0_21 = arith.constant 0 : index
    %17 = vector.load %arg7[%c0_19, %c2, %c0_20, %c0_21] : memref<1x4x8x8xf32, #tpu.memory_space<vmem>>, vector<1x1x8x8xf32>
    %18 = vector.shape_cast %17 : vector<1x1x8x8xf32> to vector<8x8xf32>
    %19 = vector.shape_cast %16 : vector<8x8xf32> to vector<1x1x8x8xf32>
    tpu.vector_store %arg7[%c0_19, %c2, %c0_20, %c0_21], %19 {strides = array<i32>} : memref<1x4x8x8xf32, #tpu.memory_space<vmem>>, vector<1x1x8x8xf32>,
    %c0_22 = arith.constant 0 : index
    %c24 = arith.constant 24 : index
    %20 = vector.load %arg9[%c0_22, %c24] : memref<8x32xf32, #tpu.memory_space<vmem>>, vector<8x8xf32>
    %c0_23 = arith.constant 0 : index
    %c3 = arith.constant 3 : index
    %c0_24 = arith.constant 0 : index
    %c0_25 = arith.constant 0 : index
    %21 = vector.load %arg7[%c0_23, %c3, %c0_24, %c0_25] : memref<1x4x8x8xf32, #tpu.memory_space<vmem>>, vector<1x1x8x8xf32>
    %22 = vector.shape_cast %21 : vector<1x1x8x8xf32> to vector<8x8xf32>
    %23 = vector.shape_cast %20 : vector<8x8xf32> to vector<1x1x8x8xf32>
    tpu.vector_store %arg7[%c0_23, %c3, %c0_24, %c0_25], %23 {strides = array<i32>} : memref<1x4x8x8xf32, #tpu.memory_space<vmem>>, vector<1x1x8x8xf32>,
    %c0_26 = arith.constant 0 : index
    %c0_27 = arith.constant 0 : index
    %c0_28 = arith.constant 0 : index
    %24 = vector.load %arg2[%c0_26, %c0_27, %c0_28] : memref<1x8x32xf32, #tpu.memory_space<vmem>>, vector<1x8x32xf32>
    %25 = vector.shape_cast %24 : vector<1x8x32xf32> to vector<8x32xf32>
    %c0_29 = arith.constant 0 : index
    %c0_30 = arith.constant 0 : index
    %26 = vector.load %arg5[%c0_29, %c0_30] : memref<32x32xf32, #tpu.memory_space<vmem>>, vector<32x32xf32>
    %cst_31 = arith.constant dense<0.000000e+00> : vector<8x32xf32>
    %27 = tpu.matmul %25, %26, %cst_31 {dimension_numbers = #tpu.dot_dimension_numbers<[1], [0], [0], [1], [0, 0, 1, 1], [], []>} : vector<8x32xf32>, vector<32x32xf32>, vector<8x32xf32> -> vector<8x32xf32>
    %c0_32 = arith.constant 0 : index
    %c0_33 = arith.constant 0 : index
    %28 = vector.load %arg6[%c0_32, %c0_33] : memref<1x32xf32, #tpu.memory_space<vmem>>, vector<1x32xf32>
    %29 = vector.broadcast %28 : vector<1x32xf32> to vector<8x32xf32>
    %30 = arith.addf %27, %29 : vector<8x32xf32>
    %c0_34 = arith.constant 0 : index
    %c0_35 = arith.constant 0 : index
    %31 = vector.load %arg9[%c0_34, %c0_35] : memref<8x32xf32, #tpu.memory_space<vmem>>, vector<8x32xf32>
    tpu.vector_store %arg9[%c0_34, %c0_35], %30 {strides = array<i32>} : memref<8x32xf32, #tpu.memory_space<vmem>>, vector<8x32xf32>,
    %c0_36 = arith.constant 0 : index
    %c0_37 = arith.constant 0 : index
    %32 = vector.load %arg9[%c0_36, %c0_37] : memref<8x32xf32, #tpu.memory_space<vmem>>, vector<8x8xf32>
    %c0_38 = arith.constant 0 : index
    %c0_39 = arith.constant 0 : index
    %c0_40 = arith.constant 0 : index
    %c0_41 = arith.constant 0 : index
    %33 = vector.load %arg8[%c0_38, %c0_39, %c0_40, %c0_41] : memref<1x4x8x8xf32, #tpu.memory_space<vmem>>, vector<1x1x8x8xf32>
    %34 = vector.shape_cast %33 : vector<1x1x8x8xf32> to vector<8x8xf32>
    %35 = vector.shape_cast %32 : vector<8x8xf32> to vector<1x1x8x8xf32>
    tpu.vector_store %arg8[%c0_38, %c0_39, %c0_40, %c0_41], %35 {strides = array<i32>} : memref<1x4x8x8xf32, #tpu.memory_space<vmem>>, vector<1x1x8x8xf32>,
    %c0_42 = arith.constant 0 : index
    %c8_43 = arith.constant 8 : index
    %36 = vector.load %arg9[%c0_42, %c8_43] : memref<8x32xf32, #tpu.memory_space<vmem>>, vector<8x8xf32>
    %c0_44 = arith.constant 0 : index
    %c1_45 = arith.constant 1 : index
    %c0_46 = arith.constant 0 : index
    %c0_47 = arith.constant 0 : index
    %37 = vector.load %arg8[%c0_44, %c1_45, %c0_46, %c0_47] : memref<1x4x8x8xf32, #tpu.memory_space<vmem>>, vector<1x1x8x8xf32>
    %38 = vector.shape_cast %37 : vector<1x1x8x8xf32> to vector<8x8xf32>
    %39 = vector.shape_cast %36 : vector<8x8xf32> to vector<1x1x8x8xf32>
    tpu.vector_store %arg8[%c0_44, %c1_45, %c0_46, %c0_47], %39 {strides = array<i32>} : memref<1x4x8x8xf32, #tpu.memory_space<vmem>>, vector<1x1x8x8xf32>,
    %c0_48 = arith.constant 0 : index
    %c16_49 = arith.constant 16 : index
    %40 = vector.load %arg9[%c0_48, %c16_49] : memref<8x32xf32, #tpu.memory_space<vmem>>, vector<8x8xf32>
    %c0_50 = arith.constant 0 : index
    %c2_51 = arith.constant 2 : index
    %c0_52 = arith.constant 0 : index
    %c0_53 = arith.constant 0 : index
    %41 = vector.load %arg8[%c0_50, %c2_51, %c0_52, %c0_53] : memref<1x4x8x8xf32, #tpu.memory_space<vmem>>, vector<1x1x8x8xf32>
    %42 = vector.shape_cast %41 : vector<1x1x8x8xf32> to vector<8x8xf32>
    %43 = vector.shape_cast %40 : vector<8x8xf32> to vector<1x1x8x8xf32>
    tpu.vector_store %arg8[%c0_50, %c2_51, %c0_52, %c0_53], %43 {strides = array<i32>} : memref<1x4x8x8xf32, #tpu.memory_space<vmem>>, vector<1x1x8x8xf32>,
    %c0_54 = arith.constant 0 : index
    %c24_55 = arith.constant 24 : index
    %44 = vector.load %arg9[%c0_54, %c24_55] : memref<8x32xf32, #tpu.memory_space<vmem>>, vector<8x8xf32>
    %c0_56 = arith.constant 0 : index
    %c3_57 = arith.constant 3 : index
    %c0_58 = arith.constant 0 : index
    %c0_59 = arith.constant 0 : index
    %45 = vector.load %arg8[%c0_56, %c3_57, %c0_58, %c0_59] : memref<1x4x8x8xf32, #tpu.memory_space<vmem>>, vector<1x1x8x8xf32>
    %46 = vector.shape_cast %45 : vector<1x1x8x8xf32> to vector<8x8xf32>
    %47 = vector.shape_cast %44 : vector<8x8xf32> to vector<1x1x8x8xf32>
    tpu.vector_store %arg8[%c0_56, %c3_57, %c0_58, %c0_59], %47 {strides = array<i32>} : memref<1x4x8x8xf32, #tpu.memory_space<vmem>>, vector<1x1x8x8xf32>,
    return
  }
  func.func @transform_0(%arg0: i32) -> (i32, i32, i32) {
    %c0_i32 = arith.constant 0 : i32
    %c0_i32_0 = arith.constant 0 : i32
    %c0_i32_1 = arith.constant 0 : i32
    return %arg0, %c0_i32, %c0_i32_0 : i32, i32, i32
  }
  func.func @transform_1(%arg0: i32) -> (i32, i32, i32) {
    %c0_i32 = arith.constant 0 : i32
    %c0_i32_0 = arith.constant 0 : i32
    %c0_i32_1 = arith.constant 0 : i32
    return %arg0, %c0_i32, %c0_i32_0 : i32, i32, i32
  }
  func.func @transform_2(%arg0: i32) -> (i32, i32) {
    %c0_i32 = arith.constant 0 : i32
    %c0_i32_0 = arith.constant 0 : i32
    %c0_i32_1 = arith.constant 0 : i32
    return %c0_i32, %c0_i32_0 : i32, i32
  }
  func.func @transform_3(%arg0: i32) -> (i32, i32) {
    %c0_i32 = arith.constant 0 : i32
    %c0_i32_0 = arith.constant 0 : i32
    %c0_i32_1 = arith.constant 0 : i32
    return %c0_i32, %c0_i32_0 : i32, i32
  }
  func.func @transform_4(%arg0: i32) -> (i32, i32) {
    %c0_i32 = arith.constant 0 : i32
    %c0_i32_0 = arith.constant 0 : i32
    %c0_i32_1 = arith.constant 0 : i32
    return %c0_i32, %c0_i32_0 : i32, i32
  }
  func.func @transform_5(%arg0: i32) -> (i32, i32) {
    %c0_i32 = arith.constant 0 : i32
    %c0_i32_0 = arith.constant 0 : i32
    %c0_i32_1 = arith.constant 0 : i32
    return %c0_i32, %c0_i32_0 : i32, i32
  }
  func.func @transform_6(%arg0: i32) -> (i32, i32, i32, i32) {
    %c0_i32 = arith.constant 0 : i32
    %c0_i32_0 = arith.constant 0 : i32
    %c0_i32_1 = arith.constant 0 : i32
    %c0_i32_2 = arith.constant 0 : i32
    return %arg0, %c0_i32, %c0_i32_0, %c0_i32_1 : i32, i32, i32, i32
  }
  func.func @transform_7(%arg0: i32) -> (i32, i32, i32, i32) {
    %c0_i32 = arith.constant 0 : i32
    %c0_i32_0 = arith.constant 0 : i32
    %c0_i32_1 = arith.constant 0 : i32
    %c0_i32_2 = arith.constant 0 : i32
    return %arg0, %c0_i32, %c0_i32_0, %c0_i32_1 : i32, i32, i32, i32
  }
}

module attributes {stable_mosaic.version = 11 : i64} {
  func.func @_attention_kernel(%arg0: i32, %arg1: i32, %arg2: memref<1x8x32xf32, #tpu.memory_space<vmem>>, %arg3: memref<1x4x8x8xf32, #tpu.memory_space<vmem>>, %arg4: memref<1x4x8x8xf32, #tpu.memory_space<vmem>>, %arg5: memref<32x32xf32, #tpu.memory_space<vmem>>, %arg6: memref<1x32xf32, #tpu.memory_space<vmem>>, %arg7: memref<32x32xf32, #tpu.memory_space<vmem>>, %arg8: memref<1x32xf32, #tpu.memory_space<vmem>>, %arg9: memref<1x8x32xf32, #tpu.memory_space<vmem>>, %arg10: memref<4x8x8xf32, #tpu.memory_space<vmem>>, %arg11: memref<8x32xf32, #tpu.memory_space<vmem>>, %arg12: memref<8x32xf32, #tpu.memory_space<vmem>>) attributes {dimension_semantics = [#tpu.dimension_semantics<parallel>, #tpu.dimension_semantics<parallel>], iteration_bounds = array<i64: 2, 1>, scalar_prefetch = 0 : i64, scratch_operands = 2 : i64, tpu.core_type = #tpu.core_type<tc>, window_params = [{transform_indices = @transform_0, window_bounds = array<i64: 1, 8, 32>}, {transform_indices = @transform_1, window_bounds = array<i64: 1, 4, 8, 8>}, {transform_indices = @transform_2, window_bounds = array<i64: 1, 4, 8, 8>}, {pipeline_mode = #tpu.pipeline_mode<synchronous>, transform_indices = @transform_3, window_bounds = array<i64: 32, 32>}, {pipeline_mode = #tpu.pipeline_mode<synchronous>, transform_indices = @transform_4, window_bounds = array<i64: 1, 32>}, {pipeline_mode = #tpu.pipeline_mode<synchronous>, transform_indices = @transform_5, window_bounds = array<i64: 32, 32>}, {pipeline_mode = #tpu.pipeline_mode<synchronous>, transform_indices = @transform_6, window_bounds = array<i64: 1, 32>}, {transform_indices = @transform_7, window_bounds = array<i64: 1, 8, 32>}, {transform_indices = @transform_8, window_bounds = array<i64: 4, 8, 8>}]} {
    %c0 = arith.constant 0 : index
    %c0_0 = arith.constant 0 : index
    %c0_1 = arith.constant 0 : index
    %0 = vector.load %arg2[%c0, %c0_0, %c0_1] : memref<1x8x32xf32, #tpu.memory_space<vmem>>, vector<1x8x32xf32>
    %1 = vector.shape_cast %0 : vector<1x8x32xf32> to vector<8x32xf32>
    %c0_2 = arith.constant 0 : index
    %c0_3 = arith.constant 0 : index
    %2 = vector.load %arg5[%c0_2, %c0_3] : memref<32x32xf32, #tpu.memory_space<vmem>>, vector<32x32xf32>
    %cst = arith.constant dense<0.000000e+00> : vector<8x32xf32>
    %3 = tpu.matmul %1, %2, %cst {dimension_numbers = #tpu.dot_dimension_numbers<[1], [0], [0], [1], [0, 0, 1, 1], [], []>} : vector<8x32xf32>, vector<32x32xf32>, vector<8x32xf32> -> vector<8x32xf32>
    %c0_4 = arith.constant 0 : index
    %c0_5 = arith.constant 0 : index
    %4 = vector.load %arg6[%c0_4, %c0_5] : memref<1x32xf32, #tpu.memory_space<vmem>>, vector<1x32xf32>
    %5 = vector.broadcast %4 : vector<1x32xf32> to vector<8x32xf32>
    %6 = arith.addf %3, %5 : vector<8x32xf32>
    %c0_6 = arith.constant 0 : index
    %c0_7 = arith.constant 0 : index
    %7 = vector.load %arg11[%c0_6, %c0_7] : memref<8x32xf32, #tpu.memory_space<vmem>>, vector<8x32xf32>
    tpu.vector_store %arg11[%c0_6, %c0_7], %6 {strides = array<i32>} : memref<8x32xf32, #tpu.memory_space<vmem>>, vector<8x32xf32>,
    %c0_8 = arith.constant 0 : index
    %c0_9 = arith.constant 0 : index
    %8 = vector.load %arg11[%c0_8, %c0_9] : memref<8x32xf32, #tpu.memory_space<vmem>>, vector<8x8xf32>
    %c0_10 = arith.constant 0 : index
    %c0_11 = arith.constant 0 : index
    %c0_12 = arith.constant 0 : index
    %c0_13 = arith.constant 0 : index
    %9 = vector.load %arg3[%c0_10, %c0_11, %c0_12, %c0_13] : memref<1x4x8x8xf32, #tpu.memory_space<vmem>>, vector<1x1x8x8xf32>
    %10 = vector.shape_cast %9 : vector<1x1x8x8xf32> to vector<8x8xf32>
    %c0_14 = arith.constant 0 : index
    %c0_15 = arith.constant 0 : index
    %c0_16 = arith.constant 0 : index
    %c0_17 = arith.constant 0 : index
    %11 = vector.load %arg4[%c0_14, %c0_15, %c0_16, %c0_17] : memref<1x4x8x8xf32, #tpu.memory_space<vmem>>, vector<1x1x8x8xf32>
    %12 = vector.shape_cast %11 : vector<1x1x8x8xf32> to vector<8x8xf32>
    %cst_18 = arith.constant dense<0.000000e+00> : vector<8x8xf32>
    %13 = tpu.matmul %8, %10, %cst_18 {dimension_numbers = #tpu.dot_dimension_numbers<[1], [1], [0], [0], [0, 0, 1, 0], [], []>} : vector<8x8xf32>, vector<8x8xf32>, vector<8x8xf32> -> vector<8x8xf32>
    %cst_19 = arith.constant dense<0xFF800000> : vector<8xf32>
    %14 = vector.multi_reduction <maximumf>, %13, %cst_19 [1] : vector<8x8xf32> to vector<8xf32>
    %15 = vector.shape_cast %14 : vector<8xf32> to vector<8x1xf32>
    %16 = vector.broadcast %15 : vector<8x1xf32> to vector<8x8xf32>
    %17 = arith.subf %13, %16 : vector<8x8xf32>
    %18 = math.exp %17 : vector<8x8xf32>
    %cst_20 = arith.constant dense<0.000000e+00> : vector<8xf32>
    %19 = vector.multi_reduction <add>, %18, %cst_20 [1] : vector<8x8xf32> to vector<8xf32>
    %20 = vector.shape_cast %19 : vector<8xf32> to vector<8x1xf32>
    %21 = tpu.reciprocal %20 {approx = true} : vector<8x1xf32> -> vector<8x1xf32>
    %22 = arith.mulf %20, %21 : vector<8x1xf32>
    %cst_21 = arith.constant 2.000000e+00 : f32
    %23 = vector.broadcast %cst_21 : f32 to vector<8x1xf32>
    %24 = arith.subf %23, %22 : vector<8x1xf32>
    %25 = arith.mulf %21, %24 : vector<8x1xf32>
    %26 = vector.broadcast %25 : vector<8x1xf32> to vector<8x8xf32>
    %27 = arith.mulf %18, %26 : vector<8x8xf32>
    %c0_22 = arith.constant 0 : index
    %c0_23 = arith.constant 0 : index
    %c0_24 = arith.constant 0 : index
    %28 = vector.load %arg10[%c0_22, %c0_23, %c0_24] : memref<4x8x8xf32, #tpu.memory_space<vmem>>, vector<1x8x8xf32>
    %29 = vector.shape_cast %28 : vector<1x8x8xf32> to vector<8x8xf32>
    %30 = vector.shape_cast %27 : vector<8x8xf32> to vector<1x8x8xf32>
    tpu.vector_store %arg10[%c0_22, %c0_23, %c0_24], %30 {strides = array<i32>} : memref<4x8x8xf32, #tpu.memory_space<vmem>>, vector<1x8x8xf32>,
    %cst_25 = arith.constant dense<0.000000e+00> : vector<8x8xf32>
    %31 = tpu.matmul %27, %12, %cst_25 {dimension_numbers = #tpu.dot_dimension_numbers<[1], [0], [0], [1], [0, 0, 1, 1], [], []>} : vector<8x8xf32>, vector<8x8xf32>, vector<8x8xf32> -> vector<8x8xf32>
    %c0_26 = arith.constant 0 : index
    %c0_27 = arith.constant 0 : index
    %32 = vector.load %arg12[%c0_26, %c0_27] : memref<8x32xf32, #tpu.memory_space<vmem>>, vector<8x8xf32>
    tpu.vector_store %arg12[%c0_26, %c0_27], %31 {strides = array<i32>} : memref<8x32xf32, #tpu.memory_space<vmem>>, vector<8x8xf32>,
    %c0_28 = arith.constant 0 : index
    %c8 = arith.constant 8 : index
    %33 = vector.load %arg11[%c0_28, %c8] : memref<8x32xf32, #tpu.memory_space<vmem>>, vector<8x8xf32>
    %c0_29 = arith.constant 0 : index
    %c1 = arith.constant 1 : index
    %c0_30 = arith.constant 0 : index
    %c0_31 = arith.constant 0 : index
    %34 = vector.load %arg3[%c0_29, %c1, %c0_30, %c0_31] : memref<1x4x8x8xf32, #tpu.memory_space<vmem>>, vector<1x1x8x8xf32>
    %35 = vector.shape_cast %34 : vector<1x1x8x8xf32> to vector<8x8xf32>
    %c0_32 = arith.constant 0 : index
    %c1_33 = arith.constant 1 : index
    %c0_34 = arith.constant 0 : index
    %c0_35 = arith.constant 0 : index
    %36 = vector.load %arg4[%c0_32, %c1_33, %c0_34, %c0_35] : memref<1x4x8x8xf32, #tpu.memory_space<vmem>>, vector<1x1x8x8xf32>
    %37 = vector.shape_cast %36 : vector<1x1x8x8xf32> to vector<8x8xf32>
    %cst_36 = arith.constant dense<0.000000e+00> : vector<8x8xf32>
    %38 = tpu.matmul %33, %35, %cst_36 {dimension_numbers = #tpu.dot_dimension_numbers<[1], [1], [0], [0], [0, 0, 1, 0], [], []>} : vector<8x8xf32>, vector<8x8xf32>, vector<8x8xf32> -> vector<8x8xf32>
    %cst_37 = arith.constant dense<0xFF800000> : vector<8xf32>
    %39 = vector.multi_reduction <maximumf>, %38, %cst_37 [1] : vector<8x8xf32> to vector<8xf32>
    %40 = vector.shape_cast %39 : vector<8xf32> to vector<8x1xf32>
    %41 = vector.broadcast %40 : vector<8x1xf32> to vector<8x8xf32>
    %42 = arith.subf %38, %41 : vector<8x8xf32>
    %43 = math.exp %42 : vector<8x8xf32>
    %cst_38 = arith.constant dense<0.000000e+00> : vector<8xf32>
    %44 = vector.multi_reduction <add>, %43, %cst_38 [1] : vector<8x8xf32> to vector<8xf32>
    %45 = vector.shape_cast %44 : vector<8xf32> to vector<8x1xf32>
    %46 = tpu.reciprocal %45 {approx = true} : vector<8x1xf32> -> vector<8x1xf32>
    %47 = arith.mulf %45, %46 : vector<8x1xf32>
    %cst_39 = arith.constant 2.000000e+00 : f32
    %48 = vector.broadcast %cst_39 : f32 to vector<8x1xf32>
    %49 = arith.subf %48, %47 : vector<8x1xf32>
    %50 = arith.mulf %46, %49 : vector<8x1xf32>
    %51 = vector.broadcast %50 : vector<8x1xf32> to vector<8x8xf32>
    %52 = arith.mulf %43, %51 : vector<8x8xf32>
    %c1_40 = arith.constant 1 : index
    %c0_41 = arith.constant 0 : index
    %c0_42 = arith.constant 0 : index
    %53 = vector.load %arg10[%c1_40, %c0_41, %c0_42] : memref<4x8x8xf32, #tpu.memory_space<vmem>>, vector<1x8x8xf32>
    %54 = vector.shape_cast %53 : vector<1x8x8xf32> to vector<8x8xf32>
    %55 = vector.shape_cast %52 : vector<8x8xf32> to vector<1x8x8xf32>
    tpu.vector_store %arg10[%c1_40, %c0_41, %c0_42], %55 {strides = array<i32>} : memref<4x8x8xf32, #tpu.memory_space<vmem>>, vector<1x8x8xf32>,
    %cst_43 = arith.constant dense<0.000000e+00> : vector<8x8xf32>
    %56 = tpu.matmul %52, %37, %cst_43 {dimension_numbers = #tpu.dot_dimension_numbers<[1], [0], [0], [1], [0, 0, 1, 1], [], []>} : vector<8x8xf32>, vector<8x8xf32>, vector<8x8xf32> -> vector<8x8xf32>
    %c0_44 = arith.constant 0 : index
    %c8_45 = arith.constant 8 : index
    %57 = vector.load %arg12[%c0_44, %c8_45] : memref<8x32xf32, #tpu.memory_space<vmem>>, vector<8x8xf32>
    tpu.vector_store %arg12[%c0_44, %c8_45], %56 {strides = array<i32>} : memref<8x32xf32, #tpu.memory_space<vmem>>, vector<8x8xf32>,
    %c0_46 = arith.constant 0 : index
    %c16 = arith.constant 16 : index
    %58 = vector.load %arg11[%c0_46, %c16] : memref<8x32xf32, #tpu.memory_space<vmem>>, vector<8x8xf32>
    %c0_47 = arith.constant 0 : index
    %c2 = arith.constant 2 : index
    %c0_48 = arith.constant 0 : index
    %c0_49 = arith.constant 0 : index
    %59 = vector.load %arg3[%c0_47, %c2, %c0_48, %c0_49] : memref<1x4x8x8xf32, #tpu.memory_space<vmem>>, vector<1x1x8x8xf32>
    %60 = vector.shape_cast %59 : vector<1x1x8x8xf32> to vector<8x8xf32>
    %c0_50 = arith.constant 0 : index
    %c2_51 = arith.constant 2 : index
    %c0_52 = arith.constant 0 : index
    %c0_53 = arith.constant 0 : index
    %61 = vector.load %arg4[%c0_50, %c2_51, %c0_52, %c0_53] : memref<1x4x8x8xf32, #tpu.memory_space<vmem>>, vector<1x1x8x8xf32>
    %62 = vector.shape_cast %61 : vector<1x1x8x8xf32> to vector<8x8xf32>
    %cst_54 = arith.constant dense<0.000000e+00> : vector<8x8xf32>
    %63 = tpu.matmul %58, %60, %cst_54 {dimension_numbers = #tpu.dot_dimension_numbers<[1], [1], [0], [0], [0, 0, 1, 0], [], []>} : vector<8x8xf32>, vector<8x8xf32>, vector<8x8xf32> -> vector<8x8xf32>
    %cst_55 = arith.constant dense<0xFF800000> : vector<8xf32>
    %64 = vector.multi_reduction <maximumf>, %63, %cst_55 [1] : vector<8x8xf32> to vector<8xf32>
    %65 = vector.shape_cast %64 : vector<8xf32> to vector<8x1xf32>
    %66 = vector.broadcast %65 : vector<8x1xf32> to vector<8x8xf32>
    %67 = arith.subf %63, %66 : vector<8x8xf32>
    %68 = math.exp %67 : vector<8x8xf32>
    %cst_56 = arith.constant dense<0.000000e+00> : vector<8xf32>
    %69 = vector.multi_reduction <add>, %68, %cst_56 [1] : vector<8x8xf32> to vector<8xf32>
    %70 = vector.shape_cast %69 : vector<8xf32> to vector<8x1xf32>
    %71 = tpu.reciprocal %70 {approx = true} : vector<8x1xf32> -> vector<8x1xf32>
    %72 = arith.mulf %70, %71 : vector<8x1xf32>
    %cst_57 = arith.constant 2.000000e+00 : f32
    %73 = vector.broadcast %cst_57 : f32 to vector<8x1xf32>
    %74 = arith.subf %73, %72 : vector<8x1xf32>
    %75 = arith.mulf %71, %74 : vector<8x1xf32>
    %76 = vector.broadcast %75 : vector<8x1xf32> to vector<8x8xf32>
    %77 = arith.mulf %68, %76 : vector<8x8xf32>
    %c2_58 = arith.constant 2 : index
    %c0_59 = arith.constant 0 : index
    %c0_60 = arith.constant 0 : index
    %78 = vector.load %arg10[%c2_58, %c0_59, %c0_60] : memref<4x8x8xf32, #tpu.memory_space<vmem>>, vector<1x8x8xf32>
    %79 = vector.shape_cast %78 : vector<1x8x8xf32> to vector<8x8xf32>
    %80 = vector.shape_cast %77 : vector<8x8xf32> to vector<1x8x8xf32>
    tpu.vector_store %arg10[%c2_58, %c0_59, %c0_60], %80 {strides = array<i32>} : memref<4x8x8xf32, #tpu.memory_space<vmem>>, vector<1x8x8xf32>,
    %cst_61 = arith.constant dense<0.000000e+00> : vector<8x8xf32>
    %81 = tpu.matmul %77, %62, %cst_61 {dimension_numbers = #tpu.dot_dimension_numbers<[1], [0], [0], [1], [0, 0, 1, 1], [], []>} : vector<8x8xf32>, vector<8x8xf32>, vector<8x8xf32> -> vector<8x8xf32>
    %c0_62 = arith.constant 0 : index
    %c16_63 = arith.constant 16 : index
    %82 = vector.load %arg12[%c0_62, %c16_63] : memref<8x32xf32, #tpu.memory_space<vmem>>, vector<8x8xf32>
    tpu.vector_store %arg12[%c0_62, %c16_63], %81 {strides = array<i32>} : memref<8x32xf32, #tpu.memory_space<vmem>>, vector<8x8xf32>,
    %c0_64 = arith.constant 0 : index
    %c24 = arith.constant 24 : index
    %83 = vector.load %arg11[%c0_64, %c24] : memref<8x32xf32, #tpu.memory_space<vmem>>, vector<8x8xf32>
    %c0_65 = arith.constant 0 : index
    %c3 = arith.constant 3 : index
    %c0_66 = arith.constant 0 : index
    %c0_67 = arith.constant 0 : index
    %84 = vector.load %arg3[%c0_65, %c3, %c0_66, %c0_67] : memref<1x4x8x8xf32, #tpu.memory_space<vmem>>, vector<1x1x8x8xf32>
    %85 = vector.shape_cast %84 : vector<1x1x8x8xf32> to vector<8x8xf32>
    %c0_68 = arith.constant 0 : index
    %c3_69 = arith.constant 3 : index
    %c0_70 = arith.constant 0 : index
    %c0_71 = arith.constant 0 : index
    %86 = vector.load %arg4[%c0_68, %c3_69, %c0_70, %c0_71] : memref<1x4x8x8xf32, #tpu.memory_space<vmem>>, vector<1x1x8x8xf32>
    %87 = vector.shape_cast %86 : vector<1x1x8x8xf32> to vector<8x8xf32>
    %cst_72 = arith.constant dense<0.000000e+00> : vector<8x8xf32>
    %88 = tpu.matmul %83, %85, %cst_72 {dimension_numbers = #tpu.dot_dimension_numbers<[1], [1], [0], [0], [0, 0, 1, 0], [], []>} : vector<8x8xf32>, vector<8x8xf32>, vector<8x8xf32> -> vector<8x8xf32>
    %cst_73 = arith.constant dense<0xFF800000> : vector<8xf32>
    %89 = vector.multi_reduction <maximumf>, %88, %cst_73 [1] : vector<8x8xf32> to vector<8xf32>
    %90 = vector.shape_cast %89 : vector<8xf32> to vector<8x1xf32>
    %91 = vector.broadcast %90 : vector<8x1xf32> to vector<8x8xf32>
    %92 = arith.subf %88, %91 : vector<8x8xf32>
    %93 = math.exp %92 : vector<8x8xf32>
    %cst_74 = arith.constant dense<0.000000e+00> : vector<8xf32>
    %94 = vector.multi_reduction <add>, %93, %cst_74 [1] : vector<8x8xf32> to vector<8xf32>
    %95 = vector.shape_cast %94 : vector<8xf32> to vector<8x1xf32>
    %96 = tpu.reciprocal %95 {approx = true} : vector<8x1xf32> -> vector<8x1xf32>
    %97 = arith.mulf %95, %96 : vector<8x1xf32>
    %cst_75 = arith.constant 2.000000e+00 : f32
    %98 = vector.broadcast %cst_75 : f32 to vector<8x1xf32>
    %99 = arith.subf %98, %97 : vector<8x1xf32>
    %100 = arith.mulf %96, %99 : vector<8x1xf32>
    %101 = vector.broadcast %100 : vector<8x1xf32> to vector<8x8xf32>
    %102 = arith.mulf %93, %101 : vector<8x8xf32>
    %c3_76 = arith.constant 3 : index
    %c0_77 = arith.constant 0 : index
    %c0_78 = arith.constant 0 : index
    %103 = vector.load %arg10[%c3_76, %c0_77, %c0_78] : memref<4x8x8xf32, #tpu.memory_space<vmem>>, vector<1x8x8xf32>
    %104 = vector.shape_cast %103 : vector<1x8x8xf32> to vector<8x8xf32>
    %105 = vector.shape_cast %102 : vector<8x8xf32> to vector<1x8x8xf32>
    tpu.vector_store %arg10[%c3_76, %c0_77, %c0_78], %105 {strides = array<i32>} : memref<4x8x8xf32, #tpu.memory_space<vmem>>, vector<1x8x8xf32>,
    %cst_79 = arith.constant dense<0.000000e+00> : vector<8x8xf32>
    %106 = tpu.matmul %102, %87, %cst_79 {dimension_numbers = #tpu.dot_dimension_numbers<[1], [0], [0], [1], [0, 0, 1, 1], [], []>} : vector<8x8xf32>, vector<8x8xf32>, vector<8x8xf32> -> vector<8x8xf32>
    %c0_80 = arith.constant 0 : index
    %c24_81 = arith.constant 24 : index
    %107 = vector.load %arg12[%c0_80, %c24_81] : memref<8x32xf32, #tpu.memory_space<vmem>>, vector<8x8xf32>
    tpu.vector_store %arg12[%c0_80, %c24_81], %106 {strides = array<i32>} : memref<8x32xf32, #tpu.memory_space<vmem>>, vector<8x8xf32>,
    %c0_82 = arith.constant 0 : index
    %c0_83 = arith.constant 0 : index
    %108 = vector.load %arg12[%c0_82, %c0_83] : memref<8x32xf32, #tpu.memory_space<vmem>>, vector<8x32xf32>
    %c0_84 = arith.constant 0 : index
    %c0_85 = arith.constant 0 : index
    %109 = vector.load %arg7[%c0_84, %c0_85] : memref<32x32xf32, #tpu.memory_space<vmem>>, vector<32x32xf32>
    %cst_86 = arith.constant dense<0.000000e+00> : vector<8x32xf32>
    %110 = tpu.matmul %108, %109, %cst_86 {dimension_numbers = #tpu.dot_dimension_numbers<[1], [0], [0], [1], [0, 0, 1, 1], [], []>} : vector<8x32xf32>, vector<32x32xf32>, vector<8x32xf32> -> vector<8x32xf32>
    %c0_87 = arith.constant 0 : index
    %c0_88 = arith.constant 0 : index
    %111 = vector.load %arg8[%c0_87, %c0_88] : memref<1x32xf32, #tpu.memory_space<vmem>>, vector<1x32xf32>
    %112 = vector.broadcast %111 : vector<1x32xf32> to vector<8x32xf32>
    %113 = arith.addf %110, %112 : vector<8x32xf32>
    %c0_89 = arith.constant 0 : index
    %c0_90 = arith.constant 0 : index
    %c0_91 = arith.constant 0 : index
    %114 = vector.load %arg9[%c0_89, %c0_90, %c0_91] : memref<1x8x32xf32, #tpu.memory_space<vmem>>, vector<1x8x32xf32>
    %115 = vector.shape_cast %114 : vector<1x8x32xf32> to vector<8x32xf32>
    %116 = vector.shape_cast %113 : vector<8x32xf32> to vector<1x8x32xf32>
    tpu.vector_store %arg9[%c0_89, %c0_90, %c0_91], %116 {strides = array<i32>} : memref<1x8x32xf32, #tpu.memory_space<vmem>>, vector<1x8x32xf32>,
    return
  }
  func.func @transform_0(%arg0: i32, %arg1: i32) -> (i32, i32, i32) {
    %c0_i32 = arith.constant 0 : i32
    %c0_i32_0 = arith.constant 0 : i32
    return %arg0, %arg1, %c0_i32 : i32, i32, i32
  }
  func.func @transform_1(%arg0: i32, %arg1: i32) -> (i32, i32, i32, i32) {
    %c0_i32 = arith.constant 0 : i32
    %c0_i32_0 = arith.constant 0 : i32
    %c0_i32_1 = arith.constant 0 : i32
    %c0_i32_2 = arith.constant 0 : i32
    return %arg0, %c0_i32, %c0_i32_0, %c0_i32_1 : i32, i32, i32, i32
  }
  func.func @transform_2(%arg0: i32, %arg1: i32) -> (i32, i32, i32, i32) {
    %c0_i32 = arith.constant 0 : i32
    %c0_i32_0 = arith.constant 0 : i32
    %c0_i32_1 = arith.constant 0 : i32
    %c0_i32_2 = arith.constant 0 : i32
    return %arg0, %c0_i32, %c0_i32_0, %c0_i32_1 : i32, i32, i32, i32
  }
  func.func @transform_3(%arg0: i32, %arg1: i32) -> (i32, i32) {
    %c0_i32 = arith.constant 0 : i32
    %c0_i32_0 = arith.constant 0 : i32
    %c0_i32_1 = arith.constant 0 : i32
    return %c0_i32, %c0_i32_0 : i32, i32
  }
  func.func @transform_4(%arg0: i32, %arg1: i32) -> (i32, i32) {
    %c0_i32 = arith.constant 0 : i32
    %c0_i32_0 = arith.constant 0 : i32
    %c0_i32_1 = arith.constant 0 : i32
    return %c0_i32, %c0_i32_0 : i32, i32
  }
  func.func @transform_5(%arg0: i32, %arg1: i32) -> (i32, i32) {
    %c0_i32 = arith.constant 0 : i32
    %c0_i32_0 = arith.constant 0 : i32
    %c0_i32_1 = arith.constant 0 : i32
    return %c0_i32, %c0_i32_0 : i32, i32
  }
  func.func @transform_6(%arg0: i32, %arg1: i32) -> (i32, i32) {
    %c0_i32 = arith.constant 0 : i32
    %c0_i32_0 = arith.constant 0 : i32
    %c0_i32_1 = arith.constant 0 : i32
    return %c0_i32, %c0_i32_0 : i32, i32
  }
  func.func @transform_7(%arg0: i32, %arg1: i32) -> (i32, i32, i32) {
    %c0_i32 = arith.constant 0 : i32
    %c0_i32_0 = arith.constant 0 : i32
    return %arg0, %arg1, %c0_i32 : i32, i32, i32
  }
  func.func @transform_8(%arg0: i32, %arg1: i32) -> (i32, i32, i32) {
    %c0_i32 = arith.constant 0 : i32
    %c0_i32_0 = arith.constant 0 : i32
    return %arg0, %arg1, %c0_i32 : i32, i32, i32
  }
}

</mosaic_0001>

<bundles_post_ra>
// kernel: mha_container_forward.2
= control target key start
LH: loop header
LB: loop body
LE: loop exit
PB: predicated region body
PF: predicated region fallthrough
CT: control target
= control target key end

     0   :  { %s763_s24 = smov 0   ;;  %s832_s0 = inlined_call_operand.vmem [shape: f32[2,8,32], index: 0, kind: input, shape index: {}]   ;;  %s833_s1 = inlined_call_operand.vmem [shape: f32[2,8,32], index: 1, kind: input, shape index: {}]   ;;  %s834_s2 = inlined_call_operand.vmem [shape: f32[32,32], index: 2, kind: input, shape index: {}]   ;;  %s835_s3 = inlined_call_operand.vmem [shape: f32[1,32], index: 3, kind: input, shape index: {}]   ;;  %s836_s4 = inlined_call_operand.vmem [shape: f32[32,32], index: 4, kind: input, shape index: {}]   ;;  %s837_s5 = inlined_call_operand.vmem [shape: f32[1,32], index: 5, kind: input, shape index: {}]   ;;  %s838_s6 = inlined_call_operand.vmem [shape: f32[2,4,8,8], index: 6, kind: output, shape index: {0}]   ;;  %s839_s7 = inlined_call_operand.vmem [shape: f32[2,4,8,8], index: 7, kind: output, shape index: {1}]  }
   0x1 LB: > { %s626_s25 = sadd.s32 4294967295, %s715_s24   ;;  %p630_p0 = scmp.ge.s32.totalorder %s715_s24, 1  ;;  %s715_s24 = sphi %s763_s24, %s18_s24  }
   0x2   : > { %p248_p1 = scmp.lt.s32.totalorder %s715_s24, 3 }
   0x4   : > { %p249_p2 = pnand %p630_p0, %p248_p1 }
   0x5   : > { %v307_v0 = vld [vmem:[%s834_s2] sm:$0xff] (!%p249_p2)  ;;  %v308_v1 = vld [vmem:[%s834_s2 + $0x8] sm:$0xff] (!%p249_p2)  ;;  %v309_v2 = vld [vmem:[%s834_s2 + $0x10] sm:$0xff] (!%p249_p2)  ;;  %v717_v3 = vmov (!%p249_p2), 0.0|0.0   ;;  %vm718_vm0 = vmmov (!%p249_p2), 0   ;;  %v719_v6 = vmov (!%p249_p2), 0.0  }
   0x6   : > { %252 = sbr.rel (%p249_p2) target bundleno = 367 (0x16f), region = 44  ;;  %683 = vmatprep.subr.bf16.mxu0 (!%p249_p2), %v717_v3  ;;  %v684_v4 = vpack.c.bf16 (!%p249_p2), %v308_v1, %v307_v0  ;;  %v310_v5 = vld [vmem:[%s834_s2 + $0x18] sm:$0xff] (!%p249_p2)  ;;  %669 = vmatprep.mubr.msk.f32.mxu0 (!%p249_p2), %vm718_vm0, %v719_v6  ;;  %p288_p3 = scmp.lt.s32.totalorder (!%p249_p2), %s626_s25, 1  ;;  %v418_v7 = vld [vmem:[%s836_s4] sm:$0xff] (!%p249_p2)  ;;  %v419_v8 = vld [vmem:[%s836_s4 + $0x8] sm:$0xff] (!%p249_p2)  ;;  %vm318_vm1 = vcmask (!%p249_p2), 261120  }
   0x7   : > { %689 = vmatprep.subr.bf16.mxu1 (!%p249_p2), %v717_v3  ;;  %v690_v9 = vpack.c.bf16 (!%p249_p2), %v419_v8, %v418_v7  ;;  %v420_v10 = vld [vmem:[%s836_s4 + $0x10] sm:$0xff] (!%p249_p2)  ;;  %v421_v11 = vld [vmem:[%s836_s4 + $0x18] sm:$0xff] (!%p249_p2)  ;;  %680 = vmatprep.mubr.msk.f32.mxu1 (!%p249_p2), %vm718_vm0, %v719_v6  ;;  %v687_v12 = vpack.c.bf16 (!%p249_p2), %v310_v5, %v309_v2  ;;  %v637_v16 = vld [vmem:[%s835_s3] ss:$0 sm:$0xff] (!%p249_p2)  ;;  %vm394_vm2 = vcmask (!%p249_p2), 64512   ;;  %s720_s13 = smov (!%p249_p2), 104  }
   0x8   : > { %685 = vmatpush3.bf16.msra.mxu0 (!%p249_p2), %v684_v4  ;;  %v693_v13 = vpack.c.bf16 (!%p249_p2), %v421_v11, %v420_v10  ;;  %v642_v22 = vld [vmem:[%s837_s5] ss:$0 sm:$0xff] (!%p249_p2)  ;;  %s721_s14 = smov (!%p249_p2), 120   ;;  %s722_s15 = smov (!%p249_p2), 112  }
   0x9   : > { %686 = vmatprep.subr.bf16.mxu0 (!%p249_p2), %v717_v3  ;;  %691 = vmatpush3.bf16.msra.mxu1 (!%p249_p2), %v690_v9 }
   0xa   : > { %692 = vmatprep.subr.bf16.mxu1 (!%p249_p2), %v717_v3 }
   0xc   : > { %688 = vmatpush3.bf16.msra.mxu0 (!%p249_p2), %v687_v12 }
   0xd   : > { %s841_s25 = smov (!%p288_p3, %s626_s25), 1  ;;  %694 = vmatpush3.bf16.msra.mxu1 %v693_v13 }
   0xe   : > { %s631_s19 = sshll.u32 %s841_s25, 3  ;;  %s649_s9 = sshll.u32 %s841_s25, 5 }
   0xf   : > { %s291_s22 = scalar_lea.vmem %s832_s0, %s631_s19  ;;  %s295_s27 = scalar_lea.vmem %s833_s1, %s631_s19 }
  0x10   : > { %v306_v14 = vld [vmem:[%s291_s22] sm:$0xff]  ;;  %s300_s12 = scalar_lea.vmem %s838_s6, %s649_s9  ;;  %s305_s25 = scalar_lea.vmem %s839_s7, %s649_s9 }
  0x11   : > { %v417_v15 = vld [vmem:[%s295_s27] sm:$0xff]  ;;  %670 = vmatmul.mubr.msk.f32.vlgmr.msra.gmra.mrb[0].mxu0 %vm318_vm1, %v306_v14 }
  0x12   : > { %681 = vmatmul.mubr.msk.f32.vlgmr.msra.gmra.mrb[0].mxu1 %vm318_vm1, %v417_v15 }
  0xe4   : > { %v388_v17 = vpop.f32.mrb[0].mxu0 }
  0xe5   : > { %v389_v18 = vadd.f32 %v637_v16, %v388_v17  ;;  %v671_v19 = vpop.f32.mrb[1].mxu0  ;;  %v498_v20 = vpop.f32.mrb[0].mxu1 }
  0xe6   : > { %v682_v21 = vpop.f32.mrb[1].mxu1  ;;  %v499_v23 = vadd.f32 %v642_v22, %v498_v20 }
  0xe7   : > { %392 = vst.msk [vmem:[#allocation2] sm:$0xff] %vm318_vm1, %v389_v18 }
  0xee   : > { %v410_v24 = vld [vmem:[#allocation2] sm:$0xff] }
  0xef   : > { %412 = vrot.lane.b32.xlu1 %v410_v24, %s720_s13  ;;  %398 = vrot.lane.b32.xlu0 %v410_v24, %s721_s14  ;;  %502 = vst.msk [vmem:[#allocation2] sm:$0xff] %vm318_vm1, %v499_v23 }
  0xf0   : > { %395 = vst.msk [vmem:[%s300_s12] sm:$0xff] %vm394_vm2, %v410_v24 }
  0xf3   : > { %405 = vrot.lane.b32.xlu0 %v410_v24, %s722_s15 }
  0xf6   : > { %v512_v25 = vld [vmem:[#allocation2] sm:$0xff] }
  0xf7   : > { %514 = vrot.lane.b32.xlu0 %v512_v25, %s722_s15  ;;  %507 = vrot.lane.b32.xlu1 %v512_v25, %s721_s14  ;;  %504 = vst.msk [vmem:[%s305_s25] sm:$0xff] %vm394_vm2, %v512_v25 }
  0xfb   : > { %521 = vrot.lane.b32.xlu1 %v512_v25, %s720_s13 }
 0x161   : > { %v413_v26 = vpop.permute.xlu1 %412  ;;  %v399_v27 = vpop.permute.xlu0 %398 }
 0x162   : > { %641 = vst.msk [vmem:[%s300_s12 + $0x18] sm:$0xff] %vm394_vm2, %v413_v26  ;;  %639 = vst.msk [vmem:[%s300_s12 + $0x8] sm:$0xff] %vm394_vm2, %v399_v27 }
 0x165   : > { %v406_v28 = vpop.permute.xlu0 %405 }
 0x166   : > { %640 = vst.msk [vmem:[%s300_s12 + $0x10] sm:$0xff] %vm394_vm2, %v406_v28 }
 0x169   : > { %v515_v29 = vpop.permute.xlu0 %514  ;;  %v508_v30 = vpop.permute.xlu1 %507 }
 0x16a   : > { %645 = vst.msk [vmem:[%s305_s25 + $0x10] sm:$0xff] %vm394_vm2, %v515_v29  ;;  %644 = vst.msk [vmem:[%s305_s25 + $0x8] sm:$0xff] %vm394_vm2, %v508_v30 }
 0x16d   : > { %v522_v31 = vpop.permute.xlu1 %521 }
 0x16e   : > { %646 = vst.msk [vmem:[%s305_s25 + $0x18] sm:$0xff] %vm394_vm2, %v522_v31 }
 0x16f PF: > { %s18_s24 = sadd.s32 1, %s715_s24  }
 0x170   : > { %p15_p4 = scmp.ge.s32.totalorder %s18_s24, 4  }
 0x172   :  { %17 = sbr.rel (!%p15_p4) target bundleno = 1 (0x1), region = 95 }

// kernel: mha_container_forward.3
= control target key start
LH: loop header
LB: loop body
LE: loop exit
PB: predicated region body
PF: predicated region fallthrough
CT: control target
= control target key end

     0   :  { %14 = vsyncpa [#allocation5], 0  ;;  %s2031_s0 = inlined_call_operand.vmem [shape: f32[2,8,32], index: 0, kind: input, shape index: {}]   ;;  %s2032_s1 = inlined_call_operand.vmem [shape: f32[2,4,8,8], index: 1, kind: input, shape index: {}]   ;;  %s2033_s2 = inlined_call_operand.vmem [shape: f32[2,4,8,8], index: 2, kind: input, shape index: {}]   ;;  %s2034_s3 = inlined_call_operand.vmem [shape: f32[32,32], index: 3, kind: input, shape index: {}]   ;;  %s2035_s4 = inlined_call_operand.vmem [shape: f32[1,32], index: 4, kind: input, shape index: {}]   ;;  %s2036_s5 = inlined_call_operand.vmem [shape: f32[32,32], index: 5, kind: input, shape index: {}]   ;;  %s2037_s6 = inlined_call_operand.vmem [shape: f32[1,32], index: 6, kind: input, shape index: {}]   ;;  %s2038_s7 = inlined_call_operand.vmem [shape: f32[2,8,32], index: 7, kind: output, shape index: {0}]   ;;  %s2039_s8 = inlined_call_operand.hbm [shape: f32[8,8,8], index: 8, kind: output, shape index: {1}]  }
   0x1   :  { %16 = vsyncpa [#allocation5 + $0x1], 0  ;;  %s1779_s27 = smov 0   ;;  %s1781_s28 = smov 0  }
   0x2   :  { %s1783_s29 = smov 0   ;;  %s1785_s30 = smov 0  }
   0x3   :  { %s1787_s9 = smov 0   ;;  %s1789_s10 = smov 0  }
   0x4 LB: > { %s1417_s11 = sadd.s32 4294967295, %s1721_s10   ;;  %s1418_s12 = sadd.s32 4294967294, %s1721_s10   ;;  %s1721_s10 = sphi %s1789_s10, %s22_s10   ;;  %s1717_s9 = sphi %s1787_s9, %s2048_s9   ;;  %s1713_s30 = sphi %s1785_s30, %s2047_s30   ;;  %s1709_s29 = sphi %s1783_s29, %s2046_s29   ;;  %s1705_s28 = sphi %s1781_s28, %s2045_s28   ;;  %s1701_s27 = sphi %s1779_s27, %s2044_s27  }
   0x5   : > { %s34_s13 = sadd.s32 1, %s1717_s9  ;;  %s235_s14 = sadd.s32 1, %s1709_s29 }
   0x6   : > { %p36_p0 = scmp.ge.s32.totalorder %s34_s13, 2  ;;  %p245_p1 = scmp.ne.s32.totalorder %s1709_s29, %s1705_s28 }
   0x7   : > { %p246_p2 = scmp.eq.s32.totalorder %s1417_s11, 1  ;;  %p251_p3 = scmp.ne.s32.totalorder %s1705_s28, %s1701_s27 }
   0x8   : > { %s2050_s13 = smov (%p36_p0, %s34_s13), 0  ;;  %p252_p5 = scmp.eq.s32.totalorder %s1418_s12, 1 }
   0x9   : > { %p1819_p4 = por %p246_p2, %p245_p1  ;;  %s230_s16 = ssub.s32 %s1717_s9, %s2050_s13 }
   0xa   : > { %p1421_p6 = scmp.ge.s32.totalorder %s1721_s10, 1  ;;  %p233_p7 = scmp.eq.s32.totalorder %s230_s16, 0 }
   0xb   : > { %p1826_p8 = por %p252_p5, %p251_p3  ;;  %p308_p9 = scmp.lt.s32.totalorder %s1721_s10, 3 }
   0xc   : > { %s1832_s18 = scalar_select %p233_p7, %s1709_s29, %s235_s14  }
   0xd   : > { %p309_p10 = pnand %p1421_p6, %p308_p9 }
   0xe   : > { %v387_v0 = vld [vmem:[%s2034_s3] sm:$0xff] (!%p309_p10)  ;;  %v388_v1 = vld [vmem:[%s2034_s3 + $0x8] sm:$0xff] (!%p309_p10)  ;;  %v389_v2 = vld [vmem:[%s2034_s3 + $0x10] sm:$0xff] (!%p309_p10)  ;;  %v1723_v3 = vmov (!%p309_p10), 0.0|0.0   ;;  %vm1724_vm0 = vmmov (!%p309_p10), 0   ;;  %v1725_v6 = vmov (!%p309_p10), 0.0  }
   0xf   : > { %312 = sbr.rel (%p309_p10) target bundleno = 1875 (0x753), region = 48  ;;  %1550 = vmatprep.subr.bf16.mxu0 (!%p309_p10), %v1723_v3  ;;  %v1551_v4 = vpack.c.bf16 (!%p309_p10), %v388_v1, %v387_v0  ;;  %v390_v5 = vld [vmem:[%s2034_s3 + $0x18] sm:$0xff] (!%p309_p10)  ;;  %1496 = vmatprep.mubr.msk.f32.mxu0 (!%p309_p10), %vm1724_vm0, %v1725_v6  ;;  %p361_p11 = scmp.lt.s32.totalorder (!%p309_p10), %s1713_s30, 1  ;;  %vm398_vm1 = vcmask (!%p309_p10), 261120   ;;  %vm476_vm2 = vcmask (!%p309_p10), 64512   ;;  %vm818_vm3 = vcmask (!%p309_p10), 130112  }
  0x10   : > { %1499 = vmatprep.subr.mxu1 (!%p309_p10), %v1725_v6  ;;  %1501 = vmatprep.mubr.msk.f32.mxu1 (!%p309_p10), %vm1724_vm0, %v1725_v6  ;;  %v1554_v7 = vpack.c.bf16 (!%p309_p10), %v390_v5, %v389_v2  ;;  %v1429_v11 = vld [vmem:[%s2035_s4] ss:$0 sm:$0xff] (!%p309_p10)  ;;  %s1726_s26 = smov (!%p309_p10), 120   ;;  %s1727_s14 = smov (!%p309_p10), 112   ;;  %vm996_vm4 = vcmask (!%p309_p10), 195712   ;;  %vm1174_vm5 = vcmask (!%p309_p10), 261312  }
  0x11   : > { %1552 = vmatpush3.bf16.msra.mxu0 (!%p309_p10), %v1551_v4  ;;  %s1728_s16 = smov (!%p309_p10), 104  }
  0x12   : > { %1553 = vmatprep.subr.bf16.mxu0 (!%p309_p10), %v1723_v3 }
  0x15   : > { %1555 = vmatpush3.bf16.msra.mxu0 (!%p309_p10), %v1554_v7 }
  0x16   : > { %s1854_s11 = scalar_select %p361_p11, %s1713_s30, 1  ;;  %1519 = vmatprep.subr.mxu0 %v1725_v6 }
  0x18   : > { %s2040_s12 = sshll.u32 %s1854_s11, 3  ;;  %s1459_s20 = sshll.u32 %s1854_s11, 5 }
  0x19   : > { %s367_s19 = scalar_lea.vmem %s2031_s0, %s2040_s12  ;;  %s1873_s23 = scalar_lea.vmem %s2032_s1, %s1459_s20 }
  0x1a   : > { %v386_v8 = vld [vmem:[%s367_s19] sm:$0xff]  ;;  %v1440_v10 = vld [vmem:[%s1873_s23 + $0x10] sm:$0xff]  ;;  %v1446_v28 = vld [vmem:[%s1873_s23 + $0x18] sm:$0xff]  ;;  %s1901_s22 = scalar_lea.vmem %s2033_s2, %s1459_s20  ;;  %s358_s20 = sand.u32 1, %s1705_s28  }
  0x1b   : > { %1497 = vmatmul.mubr.msk.f32.vlgmr.msra.gmra.mrb[0].mxu0 %vm398_vm1, %v386_v8  ;;  %v474_v9 = vld [vmem:[%s1873_s23] sm:$0xff]  ;;  %s1422_s24 = sshll.u32 %s358_s20, 5  ;;  %v1434_v38 = vld [vmem:[%s1873_s23 + $0x8] sm:$0xff]  ;;  %s1729_s23 = smov 8  }
  0x1c   : > { %1521 = vmatprep.mubr.msk.f32.mxu0 %vm1724_vm0, %v1725_v6  ;;  %1500 = vmatpush3.xpose.msk.msra.mxu1 %vm476_vm2, %v474_v9  ;;  %v475_v29 = vld [vmem:[%s1901_s22] sm:$0xff]  ;;  %s1913_s25 = scalar_lea.vmem [#allocation4], %s1422_s24  ;;  %v1435_v62 = vld [vmem:[%s1901_s22 + $0x8] sm:$0xff] }
  0x1d   : > { %1504 = vmatprep.subr.mxu1 %v1725_v6  ;;  %s1287_s19 = sshll.u32 %s1913_s25, 4  ;;  %s1971_s19 = int_to_ptr.vmem [resolvable:$true] %s1287_s19 }
  0x1e   : > { %1520 = vmatpush3.xpose.msk.msra.mxu0 %vm476_vm2, %v1440_v10 }
  0x1f   : > { %1529 = vmatprep.subr.mxu0 %v1725_v6 }
  0xee   : > { %v468_v12 = vpop.f32.mrb[0].mxu0 }
  0xef   : > { %v469_v13 = vadd.f32 %v1429_v11, %v468_v12  ;;  %v1498_v14 = vpop.f32.mrb[1].mxu0  ;;  %v1441_v12 = vld [vmem:[%s1901_s22 + $0x10] sm:$0xff] }
  0xf1   : > { %472 = vst.msk [vmem:[#allocation2] sm:$0xff] %vm398_vm1, %v469_v13 }
  0xf8   : > { %v642_v15 = vld [vmem:[#allocation2] sm:$0xff] }
  0xf9   : > { %648 = vrot.lane.b32.xlu1 %v642_v15, %s1726_s26  ;;  %1502 = vmatmul.mubr.msk.f32.vlgmr.msra.gmra.mrb[0].mxu1 %vm476_vm2, %v642_v15  ;;  %s1730_s26 = smov 16  }
  0xfa   : > { %1506 = vmatprep.mubr.msk.f32.mxu1 %vm1724_vm0, %v1725_v6  ;;  %1505 = vmatpush3.msra.mxu1 %v475_v29 }
  0xfb   : > { %1509 = vmatprep.subr.mxu1 %v1725_v6 }
  0xfd   : > { %826 = vrot.lane.b32.xlu1 %v642_v15, %s1727_s14  ;;  %s1731_s14 = smov 24  }
 0x16b   : > { %v649_v16 = vpop.permute.xlu1 %648 }
 0x16f   : > { %v827_v17 = vpop.permute.xlu1 %826 }
 0x170   : > { %1522 = vmatmul.mubr.msk.f32.vlgmr.msra.gmra.mrb[2].mxu0 %vm476_vm2, %v827_v17 }
 0x171   : > { %1531 = vmatprep.mubr.msk.f32.mxu0 %vm1724_vm0, %v1725_v6  ;;  %1530 = vmatpush3.xpose.msk.msra.mxu0 %vm476_vm2, %v1446_v28 }
 0x172   : > { %1556 = vmatprep.subr.bf16.mxu0 %v1723_v3 }
 0x1cc   : > { %v549_v18 = vpop.f32.mrb[0].mxu1 }
 0x1cd   : > { %v1503_v19 = vpop.f32.mrb[1].mxu1  ;;  %v553_v20 = vsel %vm476_vm2, %v549_v18, -inf }
 0x1ce   : > { %554 = vmax.xlane.f32.xlu0 %v553_v20 }
 0x243   : > { %v899_v21 = vpop.f32.mrb[2].mxu0 }
 0x244   : > { %v1523_v22 = vpop.f32.mrb[3].mxu0  ;;  %v903_v30 = vsel %vm476_vm2, %v899_v21, -inf }
 0x245   : > { %v1178_v22 = vld [vmem:[%s2036_s5 + $0x8] sm:$0xff] }
 0x25b   : > { %v555_v23 = vpop.xlane.xlu0 %554 }
 0x25c   : > { %v556_v24 = vsub.f32 %v549_v18, %v555_v23  ;;  %v1447_v18 = vld [vmem:[%s1901_s22 + $0x18] sm:$0xff] }
 0x25e   : > { %v557_v25 = vmul.f32 1.442695, %v556_v24  ;;  %v1179_v24 = vld [vmem:[%s2036_s5 + $0x10] sm:$0xff] }
 0x260   : > { %1627 = vpow2.f32 %v557_v25 }
 0x26a   : > { %v1628_v26 = vpop.eup %1627 }
 0x26b   : > { %v559_v27 = vsel %vm476_vm2, %v1628_v26, 0.0 }
 0x26c   : > { %560 = vadd.xlane.f32.xlu0 %v559_v27 }
 0x282   : > { %1004 = vrot.lane.b32.xlu0 %v642_v15, %s1728_s16  ;;  %s1461_s16 = sshll.u32 %s1713_s30, 9  ;;  %s1732_s30 = smov [#allocation4]  }
 0x283   : > { %s1969_s24 = scalar_lea.hbm %s2039_s8, %s1461_s16 }
 0x2a1   : > { %904 = vmax.xlane.f32.xlu0 %v903_v30 }
 0x2f9   : > { %v561_v31 = vpop.xlane.xlu0 %560 }
 0x2fa   : > { %1629 = vrcp.f32 %v561_v31 }
 0x2fd   : > { %v1005_v32 = vpop.permute.xlu0 %1004 }
 0x2fe   : > { %1532 = vmatmul.mubr.msk.f32.vlgmr.msra.gmra.mrb[4].mxu0 %vm476_vm2, %v1005_v32 }
 0x2ff   : > { %1547 = vmatprep.mubr.msk.f32.mxu0 %vm1724_vm0, %v1725_v6 }
 0x304   : > { %v1630_v33 = vpop.eup %1629 }
 0x305   : > { %v563_v34 = vmul.f32 %v1630_v33, %v561_v31 }
 0x307   : > { %v564_v35 = vsub.f32 2.0, %v563_v34 }
 0x309   : > { %v565_v36 = vmul.f32 %v1630_v33, %v564_v35 }
 0x30b   : > { %v566_v37 = vmul.f32 %v1628_v26, %v565_v36 }
 0x30d   : > { %567 = vst.msk [vmem:[%s1913_s25] sm:$0xff] %vm476_vm2, %v566_v37  ;;  %1507 = vmatmul.mubr.msk.f32.vlgmr.msra.gmra.mrb[2].mxu1 %vm476_vm2, %v566_v37 }
 0x30e   : > { %1510 = vmatpush3.xpose.msk.msra.mxu1 %vm476_vm2, %v1434_v38  ;;  %1511 = vmatprep.mubr.msk.f32.mxu1 %vm1724_vm0, %v1725_v6 }
 0x30f   : > { %1514 = vmatprep.subr.mxu1 %v1725_v6 }
 0x311   : > { %1512 = vmatmul.mubr.msk.f32.vlgmr.msra.gmra.mrb[4].mxu1 %vm476_vm2, %v649_v16 }
 0x312   : > { %1516 = vmatprep.mubr.msk.f32.mxu1 %vm1724_vm0, %v1725_v6  ;;  %1515 = vmatpush3.msra.mxu1 %v1435_v62 }
 0x313   : > { %1524 = vmatprep.subr.mxu1 %v1725_v6 }
 0x32e   : > { %v905_v47 = vpop.xlane.xlu0 %904 }
 0x32f   : > { %v906_v48 = vsub.f32 %v899_v21, %v905_v47  ;;  %v1177_v21 = vld [vmem:[%s2036_s5] sm:$0xff] }
 0x330   : > { %v1557_v23 = vpack.c.bf16 %v1178_v22, %v1177_v21 }
 0x331   : > { %v907_v51 = vmul.f32 1.442695, %v906_v48 }
 0x332   : > { %1558 = vmatpush3.bf16.msra.mxu0 %v1557_v23 }
 0x333   : > { %1559 = vmatprep.subr.bf16.mxu0 %v1723_v3 }
 0x3d1   : > { %v1077_v39 = vpop.f32.mrb[4].mxu0 }
 0x3d2   : > { %v1533_v40 = vpop.f32.mrb[5].mxu0  ;;  %v1081_v46 = vsel %vm476_vm2, %v1077_v39, -inf }
 0x3e0   : > { %v637_v41 = vpop.f32.mrb[2].mxu1 }
 0x3e1   : > { %641 = vst.msk [vmem:[#allocation3] sm:$0xff] %vm476_vm2, %v637_v41  ;;  %v1508_v42 = vpop.f32.mrb[3].mxu1 }
 0x3e4   : > { %v721_v43 = vpop.f32.mrb[4].mxu1 }
 0x3e5   : > { %v1513_v44 = vpop.f32.mrb[5].mxu1  ;;  %v725_v45 = vsel %vm476_vm2, %v721_v43, -inf }
 0x3e6   : > { %726 = vmax.xlane.f32.xlu1 %v725_v45 }
 0x3ea   : > { %1082 = vmax.xlane.f32.xlu1 %v1081_v46 }
 0x473   : > { %v727_v49 = vpop.xlane.xlu1 %726 }
 0x474   : > { %v728_v50 = vsub.f32 %v721_v43, %v727_v49 }
 0x476   : > { %v729_v52 = vmul.f32 1.442695, %v728_v50 }
 0x477   : > { %v1083_v53 = vpop.xlane.xlu1 %1082 }
 0x478   : > { %1631 = vpow2.f32 %v729_v52  ;;  %v1084_v54 = vsub.f32 %v1077_v39, %v1083_v53 }
 0x479   : > { %1633 = vpow2.f32 %v907_v51 }
 0x47a   : > { %v1085_v55 = vmul.f32 1.442695, %v1084_v54 }
 0x47c   : > { %1635 = vpow2.f32 %v1085_v55 }
 0x482   : > { %v1632_v56 = vpop.eup %1631 }
 0x483   : > { %v731_v57 = vsel %vm476_vm2, %v1632_v56, 0.0  ;;  %v1634_v58 = vpop.eup %1633 }
 0x484   : > { %732 = vadd.xlane.f32.xlu1 %v731_v57  ;;  %v909_v59 = vsel %vm476_vm2, %v1634_v58, 0.0 }
 0x486   : > { %v1636_v60 = vpop.eup %1635 }
 0x487   : > { %v1087_v61 = vsel %vm476_vm2, %v1636_v60, 0.0 }
 0x488   : > { %910 = vadd.xlane.f32.xlu1 %v909_v59 }
 0x48c   : > { %1088 = vadd.xlane.f32.xlu1 %v1087_v61 }
 0x511   : > { %v733_v63 = vpop.xlane.xlu1 %732 }
 0x512   : > { %1637 = vrcp.f32 %v733_v63 }
 0x515   : > { %v911_v0 = vpop.xlane.xlu1 %910 }
 0x516   : > { %1639 = vrcp.f32 %v911_v0 }
 0x519   : > { %v1089_v1 = vpop.xlane.xlu1 %1088 }
 0x51a   : > { %1641 = vrcp.f32 %v1089_v1 }
 0x51c   : > { %v1638_v2 = vpop.eup %1637 }
 0x51d   : > { %v735_v4 = vmul.f32 %v1638_v2, %v733_v63 }
 0x51f   : > { %v736_v5 = vsub.f32 2.0, %v735_v4 }
 0x520   : > { %v1640_v7 = vpop.eup %1639 }
 0x521   : > { %v737_v8 = vmul.f32 %v1638_v2, %v736_v5  ;;  %v913_v9 = vmul.f32 %v1640_v7, %v911_v0 }
 0x523   : > { %v738_v10 = vmul.f32 %v1632_v56, %v737_v8  ;;  %v914_v11 = vsub.f32 2.0, %v913_v9 }
 0x524   : > { %v1642_v13 = vpop.eup %1641 }
 0x525   : > { %1438 = vst.msk [vmem:[%s1913_s25 + $0x8] sm:$0xff] %vm476_vm2, %v738_v10  ;;  %v915_v14 = vmul.f32 %v1640_v7, %v914_v11  ;;  %v1091_v15 = vmul.f32 %v1642_v13, %v1089_v1  ;;  %1517 = vmatmul.mubr.msk.f32.vlgmr.msra.gmra.mrb[6].mxu1 %vm476_vm2, %v738_v10 }
 0x526   : > { %1525 = vmatpush3.msra.mxu1 %v1441_v12  ;;  %1526 = vmatprep.mubr.msk.f32.mxu1 %vm1724_vm0, %v1725_v6 }
 0x527   : > { %v916_v16 = vmul.f32 %v1634_v58, %v915_v14  ;;  %v1092_v17 = vsub.f32 2.0, %v1091_v15  ;;  %1534 = vmatprep.subr.mxu1 %v1725_v6 }
 0x529   : > { %1444 = vst.msk [vmem:[%s1913_s25 + $0x10] sm:$0xff] %vm476_vm2, %v916_v16  ;;  %v1093_v19 = vmul.f32 %v1642_v13, %v1092_v17  ;;  %1527 = vmatmul.mubr.msk.f32.vlgmr.msra.gmra.mrb[8].mxu1 %vm476_vm2, %v916_v16 }
 0x52a   : > { %1535 = vmatpush3.msra.mxu1 %v1447_v18  ;;  %1536 = vmatprep.mubr.msk.f32.mxu1 %vm1724_vm0, %v1725_v6  ;;  %v1180_v6 = vld [vmem:[%s2036_s5 + $0x18] sm:$0xff] }
 0x52b   : > { %v1094_v20 = vmul.f32 %v1636_v60, %v1093_v19  ;;  %v1560_v25 = vpack.c.bf16 %v1180_v6, %v1179_v24 }
 0x52d   : > { %1450 = vst.msk [vmem:[%s1913_s25 + $0x18] sm:$0xff] %vm476_vm2, %v1094_v20  ;;  %1537 = vmatmul.mubr.msk.f32.vlgmr.msra.gmra.mrb[10].mxu1 %vm476_vm2, %v1094_v20  ;;  %1561 = vmatpush3.bf16.msra.mxu0 %v1560_v25  ;;  %s1647_s25 = sshll.u32 %s1732_s30, 4  ;;  %s1648_s25 = int_to_ptr.vmem [resolvable:$false] %s1647_s25 }
 0x52e   : > { %s1649_s12 = scalar_lea.vmem %s1648_s25, 1024  ;;  %p1650_p1 = scmp.lt.s32.totalorder %s1971_s19, %s1648_s25 }
 0x5f8   : > { %v810_v26 = vpop.f32.mrb[6].mxu1 }
 0x5f9   : > { %815 = vrot.lane.b32.xlu1 %v810_v26, %s1729_s23  ;;  %v1518_v27 = vpop.f32.mrb[7].mxu1 }
 0x5fc   : > { %v988_v28 = vpop.f32.mrb[8].mxu1 }
 0x5fd   : > { %993 = vrot.lane.b32.xlu0 %v988_v28, %s1730_s26  ;;  %v1528_v29 = vpop.f32.mrb[9].mxu1  ;;  %s1975_s26 = scalar_lea.sflag [#allocation5], %s358_s20 }
 0x600   : > { %v1166_v30 = vpop.f32.mrb[10].mxu1 }
 0x601   : > { %1171 = vrot.lane.b32.xlu1 %v1166_v30, %s1731_s14  ;;  %v1538_v31 = vpop.f32.mrb[11].mxu1  ;;  %s1643_s14 = scalar_lea.vmem %s1971_s19, 512 }
 0x602   : > { %p1644_p12 = scmp.ne.s32.totalorder %s1971_s19, %s1643_s14  ;;  %p1651_p2 = scmp.lt.s32.totalorder %s1649_s12, %s1643_s14 }
 0x604   : > { %p1645_p13 = pnand %p1644_p12, %p1819_p4  ;;  %p1652_p3 = por %p1651_p2, %p1650_p1 }
 0x606   : > { %p1646_p0 = pneg %p1645_p13 }
 0x608   : > { %p1653_p5 = pnand %p1652_p3, %p1646_p0 }
 0x66b   : > { %v816_v32 = vpop.permute.xlu1 %815 }
 0x66c   : > { %819 = vst.msk [vmem:[#allocation3] sm:$0xff] %vm818_vm3, %v816_v32 }
 0x66f   : > { %v994_v3 = vpop.permute.xlu0 %993 }
 0x670   : > { %997 = vst.msk [vmem:[#allocation3] sm:$0xff] %vm996_vm4, %v994_v3 }
 0x673   : > { %v1172_v33 = vpop.permute.xlu1 %1171 }
 0x674   : > { %1175 = vst.msk [vmem:[#allocation3] sm:$0xff] %vm1174_vm5, %v1172_v33 }
 0x67b   : > { %v1176_v34 = vld [vmem:[#allocation3] sm:$0xff] }
 0x67c   : > { %1548 = vmatmul.mubr.msk.f32.vlgmr.msra.gmra.mrb[6].mxu0 %vm398_vm1, %v1176_v34 }
 0x67d   : > { %1656 = shalt.err (!%p1653_p5)
}
 0x67e   : > { %s1657_s20 = scalar_lea.hbm %s1969_s24, 512  ;;  %s1661_s22 = scalar_lea.hbm %s2039_s8, 1024 }
 0x67f   : > { %p1658_p6 = scmp.ne.s32.totalorder %s1969_s24, %s1657_s20  ;;  %p1662_p10 = scmp.lt.u32.totalorder %s1969_s24, %s2039_s8 }
 0x680   : > { %p1663_p11 = scmp.lt.u32.totalorder %s1661_s22, %s1657_s20  ;;  %p1665_p13 = scmp.lt.u32.totalorder %s1657_s20, %s1969_s24 }
 0x681   : > { %p1659_p7 = pnand %p1658_p6, %p1819_p4 }
 0x682   : > { %p1664_p12 = por %p1663_p11, %p1662_p10 }
 0x683   : > { %p1660_p9 = pneg %p1659_p7 }
 0x684   : > { %p1666_p0 = por %p1665_p13, %p1664_p12 }
 0x686   : > { %p1667_p1 = pnand %p1666_p0, %p1660_p9 }
 0x688   : > { %1670 = shalt.err (!%p1667_p1)
}
 0x689   : > { %s1733_s12 = smov 128   ;;  %v1452_v35 = vld [vmem:[%s2037_s6] ss:$0 sm:$0xff]  ;;  %s2043_s21 = sshll.u32 %s1854_s11, 3 }
 0x68a   : > { %1562 = dma.vmem_to_hbm [thread:$0]  (%p1819_p4), %s1971_s19, 512, %s1969_s24, %s1975_s26, %s1733_s12, %s1733_s12, %s1729_s23  }
 0x68b   : > { %s384_s20 = scalar_lea.vmem %s2038_s7, %s2043_s21 }
 0x74f   : > { %v1257_v36 = vpop.f32.mrb[6].mxu0 }
 0x750   : > { %v1258_v37 = vadd.f32 %v1452_v35, %v1257_v36  ;;  %v1549_v38 = vpop.f32.mrb[7].mxu0 }
 0x752   : > { %1261 = vst.msk [vmem:[%s384_s20] sm:$0xff] %vm398_vm1, %v1258_v37 }
 0x753 PF: > { %p1568_p2 = scmp.ge.s32.totalorder %s1721_s10, 2  ;;  %s1312_s15 = sand.u32 1, %s1701_s27  }
 0x754   : > { %s1313_s23 = scalar_lea.sflag [#allocation5], %s1312_s15 }
 0x755   : > { %p1565_p4 = pnand %p1568_p2, %p1826_p8 }
 0x757   : > { %1696 = dma.done.wait (!%p1565_p4), %s1313_s23, 512  }
 0x758   : > { %1698 = vsyncadd (!%p1565_p4), %s1313_s23, 4294966784  ;;  %s22_s10 = sadd.s32 1, %s1721_s10   ;;  %s2044_s27 = smov %s1705_s28 }
 0x759   : > { %p19_p3 = scmp.ge.s32.totalorder %s22_s10, 4   ;;  %s2045_s28 = smov %s1709_s29 }
 0x75a   : > { %s2046_s29 = smov %s1832_s18  ;;  %s2047_s30 = smov %s1717_s9 }
 0x75b   : > { %s2048_s9 = smov %s2050_s13  ;;  %21 = sbr.rel (!%p19_p3) target bundleno = 4 (0x4), region = 110 }
 0x762   :  { %1318 = vsyncpa [#allocation5], 1 }
 0x763   :  { %1320 = vsyncpa [#allocation5 + $0x1], 1 }

</bundles_post_ra>
